<compile_context>
chip_gen: v6e
topology: v6e:2x2x1
jax: 0.10.0
libtpu: 0.0.40
codegen_flags: <defaults>
</compile_context>

<pallas_src>
import math

import numpy as np
import jax
import jax.numpy as jnp
from jax.experimental import pallas as pl
from jax.experimental.pallas import tpu as pltpu


_VMEM_LIMIT_BYTES = 64 * 1024 * 1024


def _pick_tile(n, cap_bytes=None, row_bytes=0):
    """Largest power-of-two tile (<=512) dividing n, optionally VMEM-capped."""
    t = n
    for c in (512, 256, 128, 64, 32, 16, 8):
        if n % c == 0:
            t = c
            break
    if cap_bytes is not None and row_bytes > 0:
        while t > 8 and t * row_bytes > cap_bytes and n % (t // 2) == 0:
            t //= 2
    return t


# ----------------------------------------------------------------------------
# Kernel 0: SLP linear over all points (P-tiled, weights resident)
# ----------------------------------------------------------------------------
def _make_slp_kernel(use_x):
    if use_x:
        def kernel(xc_ref, x_ref, w1_ref, w2_ref, b_ref, y_ref, xp_ref):
            xp = jnp.dot(x_ref[...], w2_ref[...],
                         preferred_element_type=jnp.float32)
            xp_ref[...] = xp
            y_ref[...] = (jnp.dot(xc_ref[...], w1_ref[...],
                                  preferred_element_type=jnp.float32)
                          + xp + b_ref[...])
    else:
        def kernel(xc_ref, w1_ref, b_ref, y_ref):
            y_ref[...] = (jnp.dot(xc_ref[...], w1_ref[...],
                                  preferred_element_type=jnp.float32)
                          + b_ref[...])
    return kernel


# ----------------------------------------------------------------------------
# Kernel 1: neighbor gather + pooling + per-tile BN partial statistics
# ----------------------------------------------------------------------------
def _make_gather_pool_kernel(P, M, K, Dp, tile_m, use_x, pooling, max_value):
    center_from_gather = use_x and (P != M)

    def kernel(*refs):
        if use_x:
            gidx_ref, y_ref, xp_ref, pooled_ref, psum_ref, psumsq_ref = refs
        else:
            gidx_ref, y_ref, pooled_ref, psum_ref, psumsq_ref = refs

        y = y_ref[...]                                   # (P, Dp), VMEM-resident
        gidx = gidx_ref[...]                             # (tile_m, K), -1 = empty
        piota = jax.lax.broadcasted_iota(jnp.int32, (tile_m, P), 1)

        if use_x:
            if center_from_gather:
                # TODO(synk): Nsub != N with use_x is not exercised in this config.
                oh0 = (gidx[:, 0:1] == piota).astype(jnp.float32)
                center = jnp.dot(oh0, xp_ref[...],
                                 preferred_element_type=jnp.float32)
            else:
                center = xp_ref[...]                     # (tile_m, Dp)

        if pooling == 'sum':
            # Count matrix built directly in (tile_m, P) orientation -> one matmul.
            cnt = (gidx[:, 0:1] == piota).astype(jnp.float32)
            for k in range(1, K):
                cnt = cnt + (gidx[:, k:k + 1] == piota).astype(jnp.float32)
            pooled = jnp.dot(cnt, y, preferred_element_type=jnp.float32)
            if use_x:
                count = pooled[:, Dp - 1:Dp]             # valid-flag channel = count
                pooled = pooled - count * center
        else:  # 'max' -- per-k matmul into a running max accumulator (no KxM stack)
            pooled = None
            for k in range(K):
                oh = (gidx[:, k:k + 1] == piota).astype(jnp.float32)
                gk = jnp.dot(oh, y, preferred_element_type=jnp.float32)
                valid = gk[:, Dp - 1:Dp]                 # 1.0 real / 0.0 empty slot
                if use_x:
                    gk = gk - center
                gk = gk - max_value * (1.0 - valid)
                pooled = gk if pooled is None else jnp.maximum(pooled, gk)

        pooled_ref[...] = pooled
        # BN partials on VPU/XLU (not the MXU); reduced across tiles host-side.
        psum_ref[...] = jnp.sum(pooled, axis=0, keepdims=True)
        psumsq_ref[...] = jnp.sum(pooled * pooled, axis=0, keepdims=True)

    return kernel


# ----------------------------------------------------------------------------
# Kernel 2: BatchNorm1d (training batch stats, gamma=1, beta=0) + ReLU
# ----------------------------------------------------------------------------
def _bn_relu_kernel(pooled_ref, mean_ref, rstd_ref, out_ref):
    out_ref[...] = jnp.maximum(
        (pooled_ref[...] - mean_ref[...]) * rstd_ref[...], 0.0)


# ----------------------------------------------------------------------------
# Wrapper: one scale = SLP kernel -> gather/pool kernel -> tiny reduce -> BN kernel
# ----------------------------------------------------------------------------
def slp_pool_bn_relu_pallas(x, x_complete, indexes, weight1, weight2, bias,
                            use_x, pooling, max_value=float(10 ** 10), eps=1e-5):
    x = x.astype(jnp.float32)
    x_complete = x_complete.astype(jnp.float32)
    B, N, S = x.shape
    _, _, Cin = x_complete.shape
    _, Nsub, K = indexes.shape
    D = int(weight1.shape[0])

    # Pad channels to a multiple of 128 lanes, reserving one slot for the
    # valid-neighbor flag, so every tile load/store is lane-dense.
    Dp = ((D + 1 + 127) // 128) * 128
    P, M = B * N, B * Nsub

    # ---- host-side prep: pre-transposed, channel-padded weights ----------------
    w1p = jnp.zeros((Cin, Dp), jnp.float32).at[:, :D].set(weight1.T)
    bias_p = jnp.zeros((1, Dp), jnp.float32).at[0, :D].set(bias)
    bias_p = bias_p.at[0, Dp - 1].set(1.0)      # constant valid-flag channel
    if use_x:
        w2p = jnp.zeros((S, Dp), jnp.float32).at[:, :D].set(weight2.T)

    xc = x_complete.reshape(P, Cin)
    xs = x.reshape(P, S)

    # globally-offset neighbor indices, (b, nsub)-major rows; -1 = empty slot
    idx = indexes.astype(jnp.int32)
    offs = (jnp.arange(B, dtype=jnp.int32) * N)[:, None, None]
    gidx = jnp.where(idx >= 0, idx + offs, -1).reshape(M, K)

    cparams = pltpu.CompilerParams(dimension_semantics=("parallel",),
                                   vmem_limit_bytes=_VMEM_LIMIT_BYTES)

    # ---------------- kernel 0: SLP linear over all P points -------------------
    tile_p = _pick_tile(P)
    grid_p = (P // tile_p,)
    if use_x:
        in_specs0 = [pl.BlockSpec((tile_p, Cin), lambda p: (p, 0)),
                     pl.BlockSpec((tile_p, S), lambda p: (p, 0)),
                     pl.BlockSpec((Cin, Dp), lambda p: (0, 0)),   # resident
                     pl.BlockSpec((S, Dp), lambda p: (0, 0)),     # resident
                     pl.BlockSpec((1, Dp), lambda p: (0, 0))]     # resident
        args0 = (xc, xs, w1p, w2p, bias_p)
        out_shape0 = (jax.ShapeDtypeStruct((P, Dp), jnp.float32),
                      jax.ShapeDtypeStruct((P, Dp), jnp.float32))
        out_specs0 = (pl.BlockSpec((tile_p, Dp), lambda p: (p, 0)),
                      pl.BlockSpec((tile_p, Dp), lambda p: (p, 0)))
    else:
        in_specs0 = [pl.BlockSpec((tile_p, Cin), lambda p: (p, 0)),
                     pl.BlockSpec((Cin, Dp), lambda p: (0, 0)),
                     pl.BlockSpec((1, Dp), lambda p: (0, 0))]
        args0 = (xc, w1p, bias_p)
        out_shape0 = jax.ShapeDtypeStruct((P, Dp), jnp.float32)
        out_specs0 = pl.BlockSpec((tile_p, Dp), lambda p: (p, 0))

    y_out = pl.pallas_call(_make_slp_kernel(use_x), out_shape=out_shape0,
                           grid=grid_p, in_specs=in_specs0, out_specs=out_specs0,
                           compiler_params=cparams)(*args0)
    if use_x:
        y, xp = y_out
    else:
        y, xp = y_out, None

    # ---------------- kernel 1: gather + pool + partial BN stats ----------------
    # Per-tile gather intermediates are (tile_m, P) f32; cap the tile by budget.
    tile_m = _pick_tile(M, cap_bytes=8 * 1024 * 1024, row_bytes=P * 4)
    n_tiles = M // tile_m
    grid_m = (n_tiles,)

    kernel1 = _make_gather_pool_kernel(P, M, K, Dp, tile_m, use_x, pooling,
                                       max_value)
    in_specs1 = [pl.BlockSpec((tile_m, K), lambda m: (m, 0)),
                 pl.BlockSpec((P, Dp), lambda m: (0, 0))]         # y resident
    args1 = [gidx, y]
    if use_x:
        if P == M:
            in_specs1.append(pl.BlockSpec((tile_m, Dp), lambda m: (m, 0)))
        else:
            in_specs1.append(pl.BlockSpec((P, Dp), lambda m: (0, 0)))
        args1.append(xp)

    out_shape1 = (jax.ShapeDtypeStruct((M, Dp), jnp.float32),
                  jax.ShapeDtypeStruct((n_tiles, Dp), jnp.float32),
                  jax.ShapeDtypeStruct((n_tiles, Dp), jnp.float32))
    out_specs1 = (pl.BlockSpec((tile_m, Dp), lambda m: (m, 0)),
                  pl.BlockSpec((1, Dp), lambda m: (m, 0)),
                  pl.BlockSpec((1, Dp), lambda m: (m, 0)))

    pooled, psum, psumsq = pl.pallas_call(
        kernel1, out_shape=out_shape1, grid=grid_m,
        in_specs=in_specs1, out_specs=out_specs1,
        compiler_params=cparams)(*args1)

    # ---------------- tiny cross-tile reduce (global BN statistics) -------------
    mean = jnp.sum(psum, axis=0, keepdims=True) * (1.0 / M)          # (1, Dp)
    var = jnp.maximum(jnp.sum(psumsq, axis=0, keepdims=True) * (1.0 / M)
                      - mean * mean, 0.0)
    rstd = jax.lax.rsqrt(var + eps)

    # ---------------- kernel 2: normalize + ReLU (M-tiled) ----------------------
    in_specs2 = [pl.BlockSpec((tile_m, Dp), lambda m: (m, 0)),
                 pl.BlockSpec((1, Dp), lambda m: (0, 0)),             # resident
                 pl.BlockSpec((1, Dp), lambda m: (0, 0))]             # resident
    out = pl.pallas_call(
        _bn_relu_kernel,
        out_shape=jax.ShapeDtypeStruct((M, Dp), jnp.float32),
        grid=grid_m, in_specs=in_specs2,
        out_specs=pl.BlockSpec((tile_m, Dp), lambda m: (m, 0)),
        compiler_params=cparams)(pooled, mean, rstd)

    # drop padded / flag channels (the padded (M, Dp) slab could be consumed
    # directly by a downstream kernel to skip this copy).
    return out[:, :D].reshape(B, Nsub, D)


# ----------------------------------------------------------------------------
# ConvolutionBlock forward (nb_scales scales, crosslinks/reslinks disabled)
# ----------------------------------------------------------------------------
def convolution_block_forward(list_x, list_x_complete, list_indexes_grouping,
                              params, use_x_list, pooling_list):
    outs = []
    for i in range(len(list_x)):
        outs.append(slp_pool_bn_relu_pallas(
            list_x[i], list_x_complete[i], list_indexes_grouping[i],
            params['weight1'][i], params['weight2'][i], params['bias'][i],
            use_x_list[i], pooling_list[i]))
    return outs


# ----------------------------------------------------------------------------
# Pure-JAX reference (mirrors SLP_Pooling.forward + BN(train) + ReLU).
# ----------------------------------------------------------------------------
def slp_pool_ref(x, x_complete, indexes, w1, w2, bias, use_x, pooling,
                 max_value=float(10 ** 10)):
    B, N, _ = x.shape
    _, Nsub, K = indexes.shape
    D = w1.shape[0]
    y = jnp.einsum('bnc,dc->bnd', x_complete, w1) + bias
    if use_x:
        xp = jnp.einsum('bns,ds->bnd', x, w2)
        y = y + xp
    y_pad = jnp.concatenate([jnp.zeros((B, 1, D), jnp.float32), y], axis=1)
    idxp = indexes + 1
    gathered = jax.vmap(lambda yp, ii: yp[ii])(y_pad, idxp)        # (B,Nsub,K,D)
    if use_x and N == Nsub:
        gathered = gathered - xp[:, :, None, :]
    elif use_x:
        xp_pad = jnp.concatenate([jnp.zeros((B, 1, D), jnp.float32), xp], axis=1)
        center = jax.vmap(lambda yp, ii: yp[ii])(xp_pad, idxp[:, :, 0])
        gathered = gathered - center[:, :, None, :]
    if pooling == 'max':
        mask = (idxp[..., None] == 0).astype(jnp.float32)
        gathered = gathered - max_value * mask
        return jnp.max(gathered, axis=2)
    else:
        mask = (idxp[..., None] != 0).astype(jnp.float32)
        return jnp.sum(gathered * mask, axis=2)


def bn_relu_ref(x, eps=1e-5):
    mean = jnp.mean(x, axis=(0, 1), keepdims=True)
    var = jnp.mean((x - mean) ** 2, axis=(0, 1), keepdims=True)
    return jnp.maximum((x - mean) / jnp.sqrt(var + eps), 0.0)


# ----------------------------------------------------------------------------
if __name__ == "__main__":
    key = jax.random.PRNGKey(0)

    # ConvolutionBlock config
    nb_scales = 2
    batch_size = 2
    spatial_channels = 3
    input_channels = [4, 32]
    list_dim_slp = [32, 64]
    nb_neighbours = [8, 8]
    pooling_operation = ['max', 'sum']
    use_x = [True, False]
    num_points = [16, 16]                # N_sub == N per scale (self-grouping)

    # Deterministic parameter init (replicates reset_parameters):
    #   weight: kaiming_uniform_(a=sqrt(5)) -> U(-1/sqrt(fan_in), 1/sqrt(fan_in))
    #   bias  : U(-1/sqrt(D), 1/sqrt(D))
    params = {'weight1': [], 'weight2': [], 'bias': []}
    for i in range(nb_scales):
        key, k1, k2, k3 = jax.random.split(key, 4)
        b1 = 1.0 / math.sqrt(input_channels[i])
        params['weight1'].append(jax.random.uniform(
            k1, (list_dim_slp[i], input_channels[i]), jnp.float32, -b1, b1))
        if use_x[i]:
            b2 = 1.0 / math.sqrt(spatial_channels)
            params['weight2'].append(jax.random.uniform(
                k2, (list_dim_slp[i], spatial_channels), jnp.float32, -b2, b2))
        else:
            params['weight2'].append(None)
        bb = 1.0 / math.sqrt(list_dim_slp[i])
        params['bias'].append(jax.random.uniform(
            k3, (list_dim_slp[i],), jnp.float32, -bb, bb))

    # Inputs
    list_x, list_x_complete, list_indexes = [], [], []
    for i in range(nb_scales):
        key, kx, kc, ki = jax.random.split(key, 4)
        N = num_points[i]
        list_x.append(jax.random.normal(
            kx, (batch_size, N, spatial_channels), jnp.float32))
        list_x_complete.append(jax.random.normal(
            kc, (batch_size, N, input_channels[i]), jnp.float32))
        # neighbor indexes in [-1, N-1]; -1 marks an empty neighbor slot
        list_indexes.append(jax.random.randint(
            ki, (batch_size, N, nb_neighbours[i]), -1, N, dtype=jnp.int32))

    # Run the Pallas-backed forward
    outs = convolution_block_forward(list_x, list_x_complete, list_indexes,
                                     params, use_x, pooling_operation)
    outs = [jax.block_until_ready(o) for o in outs]

    # Validate against the pure-JAX reference of the same forward pass
    for i in range(nb_scales):
        ref_pooled = slp_pool_ref(list_x[i], list_x_complete[i], list_indexes[i],
                                  params['weight1'][i], params['weight2'][i],
                                  params['bias'][i], use_x[i], pooling_operation[i])
        ref_out = bn_relu_ref(ref_pooled)
        np.testing.assert_allclose(np.asarray(outs[i]), np.asarray(ref_out),
                                   rtol=1e-4, atol=1e-4)

    print("KERNEL_OK")
</pallas_src>

<mosaic_0001>
module attributes {stable_mosaic.version = 11 : i64} {
  func.func @kernel(%arg0: i32, %arg1: memref<32x4xf32, #tpu.memory_space<vmem>>, %arg2: memref<32x3xf32, #tpu.memory_space<vmem>>, %arg3: memref<4x128xf32, #tpu.memory_space<vmem>>, %arg4: memref<3x128xf32, #tpu.memory_space<vmem>>, %arg5: memref<1x128xf32, #tpu.memory_space<vmem>>, %arg6: memref<32x128xf32, #tpu.memory_space<vmem>>, %arg7: memref<32x128xf32, #tpu.memory_space<vmem>>) attributes {dimension_semantics = [#tpu.dimension_semantics<parallel>], iteration_bounds = array<i64: 1>, scalar_prefetch = 0 : i64, scratch_operands = 0 : i64, tpu.core_type = #tpu.core_type<tc>, window_params = [{transform_indices = @transform_0, window_bounds = array<i64: 32, 4>}, {transform_indices = @transform_1, window_bounds = array<i64: 32, 3>}, {pipeline_mode = #tpu.pipeline_mode<synchronous>, transform_indices = @transform_2, window_bounds = array<i64: 4, 128>}, {pipeline_mode = #tpu.pipeline_mode<synchronous>, transform_indices = @transform_3, window_bounds = array<i64: 3, 128>}, {pipeline_mode = #tpu.pipeline_mode<synchronous>, transform_indices = @transform_4, window_bounds = array<i64: 1, 128>}, {transform_indices = @transform_5, window_bounds = array<i64: 32, 128>}, {transform_indices = @transform_6, window_bounds = array<i64: 32, 128>}]} {
    %c0 = arith.constant 0 : index
    %c0_0 = arith.constant 0 : index
    %0 = vector.load %arg2[%c0, %c0_0] : memref<32x3xf32, #tpu.memory_space<vmem>>, vector<32x3xf32>
    %c0_1 = arith.constant 0 : index
    %c0_2 = arith.constant 0 : index
    %1 = vector.load %arg4[%c0_1, %c0_2] : memref<3x128xf32, #tpu.memory_space<vmem>>, vector<3x128xf32>
    %cst = arith.constant dense<0.000000e+00> : vector<32x128xf32>
    %2 = tpu.matmul %0, %1, %cst {dimension_numbers = #tpu.dot_dimension_numbers<[1], [0], [0], [1], [0, 0, 1, 1], [], []>} : vector<32x3xf32>, vector<3x128xf32>, vector<32x128xf32> -> vector<32x128xf32>
    %c0_3 = arith.constant 0 : index
    %c0_4 = arith.constant 0 : index
    %3 = vector.load %arg7[%c0_3, %c0_4] : memref<32x128xf32, #tpu.memory_space<vmem>>, vector<32x128xf32>
    tpu.vector_store %arg7[%c0_3, %c0_4], %2 {strides = array<i32>} : memref<32x128xf32, #tpu.memory_space<vmem>>, vector<32x128xf32>,
    %c0_5 = arith.constant 0 : index
    %c0_6 = arith.constant 0 : index
    %4 = vector.load %arg1[%c0_5, %c0_6] : memref<32x4xf32, #tpu.memory_space<vmem>>, vector<32x4xf32>
    %c0_7 = arith.constant 0 : index
    %c0_8 = arith.constant 0 : index
    %5 = vector.load %arg3[%c0_7, %c0_8] : memref<4x128xf32, #tpu.memory_space<vmem>>, vector<4x128xf32>
    %cst_9 = arith.constant dense<0.000000e+00> : vector<32x128xf32>
    %6 = tpu.matmul %4, %5, %cst_9 {dimension_numbers = #tpu.dot_dimension_numbers<[1], [0], [0], [1], [0, 0, 1, 1], [], []>} : vector<32x4xf32>, vector<4x128xf32>, vector<32x128xf32> -> vector<32x128xf32>
    %7 = arith.addf %6, %2 : vector<32x128xf32>
    %c0_10 = arith.constant 0 : index
    %c0_11 = arith.constant 0 : index
    %8 = vector.load %arg5[%c0_10, %c0_11] : memref<1x128xf32, #tpu.memory_space<vmem>>, vector<1x128xf32>
    %9 = vector.broadcast %8 : vector<1x128xf32> to vector<32x128xf32>
    %10 = arith.addf %7, %9 : vector<32x128xf32>
    %c0_12 = arith.constant 0 : index
    %c0_13 = arith.constant 0 : index
    %11 = vector.load %arg6[%c0_12, %c0_13] : memref<32x128xf32, #tpu.memory_space<vmem>>, vector<32x128xf32>
    tpu.vector_store %arg6[%c0_12, %c0_13], %10 {strides = array<i32>} : memref<32x128xf32, #tpu.memory_space<vmem>>, vector<32x128xf32>,
    return
  }
  func.func @transform_0(%arg0: i32) -> (i32, i32) {
    %c0_i32 = arith.constant 0 : i32
    %c0_i32_0 = arith.constant 0 : i32
    return %arg0, %c0_i32 : i32, i32
  }
  func.func @transform_1(%arg0: i32) -> (i32, i32) {
    %c0_i32 = arith.constant 0 : i32
    %c0_i32_0 = arith.constant 0 : i32
    return %arg0, %c0_i32 : i32, i32
  }
  func.func @transform_2(%arg0: i32) -> (i32, i32) {
    %c0_i32 = arith.constant 0 : i32
    %c0_i32_0 = arith.constant 0 : i32
    %c0_i32_1 = arith.constant 0 : i32
    return %c0_i32, %c0_i32_0 : i32, i32
  }
  func.func @transform_3(%arg0: i32) -> (i32, i32) {
    %c0_i32 = arith.constant 0 : i32
    %c0_i32_0 = arith.constant 0 : i32
    %c0_i32_1 = arith.constant 0 : i32
    return %c0_i32, %c0_i32_0 : i32, i32
  }
  func.func @transform_4(%arg0: i32) -> (i32, i32) {
    %c0_i32 = arith.constant 0 : i32
    %c0_i32_0 = arith.constant 0 : i32
    %c0_i32_1 = arith.constant 0 : i32
    return %c0_i32, %c0_i32_0 : i32, i32
  }
  func.func @transform_5(%arg0: i32) -> (i32, i32) {
    %c0_i32 = arith.constant 0 : i32
    %c0_i32_0 = arith.constant 0 : i32
    return %arg0, %c0_i32 : i32, i32
  }
  func.func @transform_6(%arg0: i32) -> (i32, i32) {
    %c0_i32 = arith.constant 0 : i32
    %c0_i32_0 = arith.constant 0 : i32
    return %arg0, %c0_i32 : i32, i32
  }
}

</mosaic_0001>

<bundles_post_ra>
// kernel: tpu_custom_call.1
= control target key start
LH: loop header
LB: loop body
LE: loop exit
PB: predicated region body
PF: predicated region fallthrough
CT: control target
= control target key end

     0   :  { %12 = vsyncpa [#allocation3], 0  ;;  %vm42_vm0 = vcmask 1042432   ;;  %vm153_vm1 = vcmask 1043456   ;;  %vm29_vm2 = vcmask 23552   ;;  %vm140_vm3 = vcmask 31744   ;;  %s460_s0 = inlined_call_operand.vmem [shape: f32[32,4], index: 0, kind: input, shape index: {}]   ;;  %s461_s1 = inlined_call_operand.vmem [shape: f32[32,3], index: 1, kind: input, shape index: {}]   ;;  %s462_s2 = inlined_call_operand.vmem [shape: f32[4,128], index: 2, kind: input, shape index: {}]   ;;  %s463_s3 = inlined_call_operand.vmem [shape: f32[3,128], index: 3, kind: input, shape index: {}]   ;;  %s464_s4 = inlined_call_operand.vmem [shape: f32[1,128], index: 4, kind: input, shape index: {}]   ;;  %s465_s5 = inlined_call_operand.hbm [shape: f32[32,128], index: 5, kind: output, shape index: {0}]   ;;  %s466_s6 = inlined_call_operand.hbm [shape: f32[32,128], index: 6, kind: output, shape index: {1}]  }
   0x1   :  { %v28_v0 = vld [vmem:[%s463_s3] sm:$0x7]  ;;  %v25_v4 = vld [vmem:[%s461_s1 + $0x8] sm:$0xff]  ;;  %v26_v6 = vld [vmem:[%s461_s1 + $0x10] sm:$0xff] }
   0x2   :  { %v139_v1 = vld [vmem:[%s462_s2] sm:$0xf]  ;;  %310 = vmatprep.subr.msk.mxu0 %vm42_vm0, %v28_v0  ;;  %v136_v5 = vld [vmem:[%s460_s0 + $0x8] sm:$0xff]  ;;  %v137_v7 = vld [vmem:[%s460_s0 + $0x10] sm:$0xff] }
   0x3   :  { %318 = vmatprep.subr.msk.mxu1 %vm153_vm1, %v139_v1  ;;  %v24_v2 = vld [vmem:[%s461_s1] sm:$0xff]  ;;  %311 = vmatpush3.msk.msra.mxu0 %vm42_vm0, %v28_v0 }
   0x4   :  { %v135_v3 = vld [vmem:[%s460_s0] sm:$0xff]  ;;  %312 = vmatprep.mubr.msk.f32.mxu0 %vm29_vm2, %v24_v2  ;;  %319 = vmatpush3.msk.msra.mxu1 %vm153_vm1, %v139_v1 }
   0x5   :  { %320 = vmatprep.mubr.msk.f32.mxu1 %vm140_vm3, %v135_v3 }
   0x6   :  { %13 = vsyncpa [#allocation5], 0  ;;  %313 = vmatmul.mubr.msk.f32.vlgmr.msra.gmra.mxu0 %vm29_vm2, %v25_v4  ;;  %321 = vmatmul.mubr.msk.f32.vlgmr.msra.gmra.mxu1 %vm140_vm3, %v136_v5  ;;  %v27_v8 = vld [vmem:[%s461_s1 + $0x18] sm:$0xff]  ;;  %v299_v12 = vld [vmem:[%s464_s4] ss:$0 sm:$0xff]  ;;  %s374_s17 = smov [#allocation4]  }
   0x7   :  { %315 = vmatprep.mubr.msk.f32.mxu0 %vm29_vm2, %v26_v6  ;;  %323 = vmatprep.mubr.msk.f32.mxu1 %vm140_vm3, %v137_v7  ;;  %v138_v9 = vld [vmem:[%s460_s0 + $0x18] sm:$0xff]  ;;  %s274_s1 = sshll.u32 %s374_s17, 4  ;;  %s375_s0 = smov [#allocation2]   ;;  %s275_s1 = int_to_ptr.vmem [resolvable:$true] %s274_s1 }
   0x8   :  { %s262_s4 = sshll.u32 %s375_s0, 4  ;;  %s330_s18 = scalar_lea.vmem %s275_s1, 512  ;;  %s263_s4 = int_to_ptr.vmem [resolvable:$true] %s262_s4 }
   0x9   :  { %p331_p0 = scmp.ne.s32.totalorder %s275_s1, %s330_s18  ;;  %p335_p1 = scmp.lt.s32.totalorder %s275_s1, %s275_s1 }
   0xa   :  { %316 = vmatmul.mubr.msk.f32.gmra.mxu0 %vm29_vm2, %v27_v8  ;;  %324 = vmatmul.mubr.msk.f32.gmra.mxu1 %vm140_vm3, %v138_v9  ;;  %p336_p2 = scmp.lt.s32.totalorder %s330_s18, %s330_s18 }
   0xc   :  { %p337_p3 = por %p336_p2, %p335_p1 }
   0xe   :  { %p338_p4 = pnand %p337_p3, %p331_p0 }
  0xc6   :  { %v314_v10 = vpop.f32.mrf.mxu0  ;;  %v322_v11 = vpop.f32.mrf.mxu1 }
  0xc7   :  { %132 = vst [vmem:[#allocation4 + $0x8] sm:$0xff] %v314_v10  ;;  %v229_v13 = vadd.f32 %v322_v11, %v314_v10 }
  0xc8   :  { %v112_v14 = vpop.f32.mrf.mxu0  ;;  %v223_v15 = vpop.f32.mrf.mxu1 }
  0xc9   :  { %v250_v16 = vadd.f32 %v299_v12, %v229_v13  ;;  %131 = vst [vmem:[#allocation4] sm:$0xff] %v112_v14  ;;  %v224_v17 = vadd.f32 %v223_v15, %v112_v14 }
  0xca   :  { %v317_v18 = vpop.f32.mrf.mxu0  ;;  %v325_v19 = vpop.f32.mrf.mxu1 }
  0xcb   :  { %254 = vst [vmem:[#allocation2 + $0x8] sm:$0xff] %v250_v16  ;;  %v249_v20 = vadd.f32 %v299_v12, %v224_v17  ;;  %134 = vst [vmem:[#allocation4 + $0x18] sm:$0xff] %v317_v18  ;;  %v239_v21 = vadd.f32 %v325_v19, %v317_v18 }
  0xcc   :  { %v122_v22 = vpop.f32.mrf.mxu0  ;;  %v233_v23 = vpop.f32.mrf.mxu1 }
  0xcd   :  { %253 = vst [vmem:[#allocation2] sm:$0xff] %v249_v20  ;;  %v252_v24 = vadd.f32 %v299_v12, %v239_v21  ;;  %133 = vst [vmem:[#allocation4 + $0x10] sm:$0xff] %v122_v22  ;;  %v234_v25 = vadd.f32 %v233_v23, %v122_v22 }
  0xce   :  { %341 = shalt.err (!%p338_p4)
}
  0xcf   :  { %s376_s19 = smov 128   ;;  %s377_s20 = smov 8   ;;  %256 = vst [vmem:[#allocation2 + $0x18] sm:$0xff] %v252_v24  ;;  %v251_v26 = vadd.f32 %v299_v12, %v234_v25 }
  0xd0   :  { %280 = dma.vmem_to_hbm [thread:$0]  %s275_s1, 512, %s466_s6, [#allocation5], %s376_s19, %s376_s19, %s377_s20  }
  0xd1   :  { %255 = vst [vmem:[#allocation2 + $0x10] sm:$0xff] %v251_v26  ;;  %s350_s23 = scalar_lea.vmem %s263_s4, 512  ;;  %p355_p6 = scmp.lt.s32.totalorder %s263_s4, %s263_s4 }
  0xd2   :  { %p351_p5 = scmp.ne.s32.totalorder %s263_s4, %s350_s23  ;;  %p356_p7 = scmp.lt.s32.totalorder %s350_s23, %s350_s23 }
  0xd4   :  { %p357_p8 = por %p356_p7, %p355_p6 }
  0xd6   :  { %p358_p9 = pnand %p357_p8, %p351_p5 }
  0xd8   :  { %361 = shalt.err (!%p358_p9)
}
  0xd9   :  { %268 = dma.vmem_to_hbm [thread:$0]  %s263_s4, 512, %s465_s5, [#allocation3], %s376_s19, %s376_s19, %s377_s20  }
  0xda   :  { %370 = dma.done.wait [#allocation3], 512  }
  0xdb   :  { %371 = vsyncadd [#allocation3], 4294966784 }
  0xdc   :  { %372 = dma.done.wait [#allocation5], 512  }
  0xdd   :  { %373 = vsyncadd [#allocation5], 4294966784 }
  0xde   :  { %287 = vsyncpa [#allocation3], 1 }
  0xdf   :  { %288 = vsyncpa [#allocation5], 1 }

</bundles_post_ra>
